<compile_context>
chip_gen: v7x
topology: tpu7x:2x2x1
jax: 0.10.0
libtpu: 0.0.40
codegen_flags: <defaults>
</compile_context>

<pallas_src>
import jax
import jax.numpy as jnp
from jax import lax
from jax.experimental import pallas as pl
from jax.experimental.pallas import tpu as pltpu


_VMEM = pl.BlockSpec(memory_space=pltpu.MemorySpace.VMEM)


def _lstm_cell(gates, c_prev, H):
    """PyTorch-ordered (i, f, g, o) LSTM cell update from pre-activation gates (B, 4H)."""
    i = jax.nn.sigmoid(gates[:, 0:H])
    f = jax.nn.sigmoid(gates[:, H:2 * H])
    g = jnp.tanh(gates[:, 2 * H:3 * H])
    o = jax.nn.sigmoid(gates[:, 3 * H:4 * H])
    c_new = f * c_prev + i * g
    h_new = o * jnp.tanh(c_new)
    return h_new, c_new


# ---------------------------------------------------------------------------
# Kernel 1: fused bidirectional LSTM layer over the full sequence
# ---------------------------------------------------------------------------
def bilstm_full_layer(x2d, fwd_params, bwd_params, T, B, H):
    """x2d: (T*B, D) time-major rows (row t*B+b = sample b at time t).

    Returns (out_f, out_b), each (T, B, H): per-time hidden states of the
    forward / backward direction (backward already re-aligned to time order).
    """
    wih_f, whh_f, b_f = fwd_params
    wih_b, whh_b, b_b = bwd_params

    def kernel(x_ref, wf_ref, uf_ref, bf_ref, wb_ref, ub_ref, bb_ref,
               outf_ref, outb_ref, gf_ref, gb_ref):
        # Phase 1: input projections for the whole sequence, bias folded in.
        x = x_ref[...]                                           # (T*B, D)
        gf_ref[...] = (jnp.dot(x, wf_ref[...],
                               preferred_element_type=jnp.float32) + bf_ref[...])
        gb_ref[...] = (jnp.dot(x, wb_ref[...],
                               preferred_element_type=jnp.float32) + bb_ref[...])
        u_f = uf_ref[...]                       # hoisted loop-invariant loads
        u_b = ub_ref[...]
        z = jnp.zeros((B, H), jnp.float32)

        # Phase 2: recurrence; fwd and bwd steps interleaved in one loop body.
        def step(t, carry):
            h_f, c_f, h_b, c_b = carry
            tb = T - 1 - t
            rf = pl.multiple_of(t * B, B)
            rb = pl.multiple_of(tb * B, B)
            gates_f = gf_ref[pl.ds(rf, B), :] + jnp.dot(
                h_f, u_f, preferred_element_type=jnp.float32)
            gates_b = gb_ref[pl.ds(rb, B), :] + jnp.dot(
                h_b, u_b, preferred_element_type=jnp.float32)
            h_f, c_f = _lstm_cell(gates_f, c_f, H)
            h_b, c_b = _lstm_cell(gates_b, c_b, H)
            outf_ref[t] = h_f.astype(outf_ref.dtype)
            outb_ref[tb] = h_b.astype(outb_ref.dtype)
            return (h_f, c_f, h_b, c_b)

        lax.fori_loop(0, T, step, (z, z, z, z))

    return pl.pallas_call(
        kernel,
        out_shape=(jax.ShapeDtypeStruct((T, B, H), jnp.float32),
                   jax.ShapeDtypeStruct((T, B, H), jnp.float32)),
        in_specs=[_VMEM] * 7,
        out_specs=(_VMEM, _VMEM),
        scratch_shapes=[pltpu.VMEM((T * B, 4 * H), jnp.float32),
                        pltpu.VMEM((T * B, 4 * H), jnp.float32)],
    )(x2d, wih_f, whh_f, b_f, wih_b, whh_b, b_b)


# ---------------------------------------------------------------------------
# Kernel 2: last bi-LSTM layer (last-time-step only) fused with the MLP head
# ---------------------------------------------------------------------------
def final_bilstm_and_head(x1f, x1b, layer_params, head_params, T, B, H):
    """x1f/x1b: (T*B, H) layer-1 fwd/bwd outputs (time-major rows) -> (B, O)."""
    wih_f, whh_f, b_f = layer_params["fwd"]
    wih_b, _whh_b, b_b = layer_params["bwd"]    # W_hh of bwd unused: h0 == 0
    # split the (2H, 4H) input weights into the rows that consume the fwd half
    # and the rows that consume the bwd half of the layer-1 output.
    wft, wfb = wih_f[:H], wih_f[H:]
    wbt, wbb = wih_b[:H], wih_b[H:]
    O = head_params["w2_t"].shape[1]

    def kernel(xf_ref, xb_ref, wft_ref, wfb_ref, uf_ref, bf_ref,
               wbt_ref, wbb_ref, bb_ref,
               lnw_ref, lnb_ref, w1_ref, b1_ref, w2_ref, b2_ref,
               out_ref, g_ref):
        # Input projection of the full sequence for the forward direction.
        g_ref[...] = (jnp.dot(xf_ref[...], wft_ref[...],
                              preferred_element_type=jnp.float32)
                      + jnp.dot(xb_ref[...], wfb_ref[...],
                                preferred_element_type=jnp.float32)
                      + bf_ref[...])
        u_f = uf_ref[...]
        z = jnp.zeros((B, H), jnp.float32)

        # Forward recurrence: keep only the final hidden state.
        def step(t, carry):
            h, c = carry
            r = pl.multiple_of(t * B, B)
            gates = g_ref[pl.ds(r, B), :] + jnp.dot(
                h, u_f, preferred_element_type=jnp.float32)
            return _lstm_cell(gates, c, H)

        h_f, _ = lax.fori_loop(0, T, step, (z, z))

        # Backward direction, last time step only: one cell from zero state
        # consuming x[T-1] (zero h0 -> no recurrent matmul needed).
        row = (T - 1) * B
        gates_b = (jnp.dot(xf_ref[pl.ds(row, B), :], wbt_ref[...],
                           preferred_element_type=jnp.float32)
                   + jnp.dot(xb_ref[pl.ds(row, B), :], wbb_ref[...],
                             preferred_element_type=jnp.float32)
                   + bb_ref[...])
        h_b, _ = _lstm_cell(gates_b, z, H)

        # Head: LayerNorm(2H) -> fc1 -> ReLU -> fc2.
        y = jnp.concatenate([h_f, h_b], axis=-1)                 # (B, 2H)
        mu = jnp.mean(y, axis=-1, keepdims=True)
        var = jnp.mean(jnp.square(y - mu), axis=-1, keepdims=True)
        y = (y - mu) * lax.rsqrt(var + 1e-5) * lnw_ref[...] + lnb_ref[...]
        h1 = jnp.maximum(
            jnp.dot(y, w1_ref[...], preferred_element_type=jnp.float32)
            + b1_ref[...], 0.0)
        out = (jnp.dot(h1, w2_ref[...], preferred_element_type=jnp.float32)
               + b2_ref[...])
        out_ref[...] = out.astype(out_ref.dtype)

    return pl.pallas_call(
        kernel,
        out_shape=jax.ShapeDtypeStruct((B, O), jnp.float32),
        in_specs=[_VMEM] * 15,
        out_specs=_VMEM,
        scratch_shapes=[pltpu.VMEM((T * B, 4 * H), jnp.float32)],
    )(x1f, x1b, wft, wfb, whh_f, b_f, wbt, wbb, b_b,
      head_params["ln_w"], head_params["ln_b"], head_params["w1_t"],
      head_params["b1"], head_params["w2_t"], head_params["b2"])


# ---------------------------------------------------------------------------
# Forward pass
# ---------------------------------------------------------------------------
def complex_rnn_forward(tokens, params):
    """tokens: (B, T) int32 -> (B, output_size) float32."""
    emb = params["embedding"][tokens]                    # (B, T, E) gather (JAX glue)
    B, T, _ = emb.shape
    H = params["lstm"][0]["fwd"][1].shape[0]             # whh_t has shape (H, 4H)
    # time-major flattened rows: row t*B + b  <->  (batch b, time t)
    x2d = jnp.transpose(emb, (1, 0, 2)).reshape(T * B, -1)

    layer1, layer2 = params["lstm"]                      # module has num_layers=2
    out_f, out_b = bilstm_full_layer(x2d, layer1["fwd"], layer1["bwd"], T, B, H)
    x1f = out_f.reshape(T * B, H)
    x1b = out_b.reshape(T * B, H)
    return final_bilstm_and_head(x1f, x1b, layer2, params["head"], T, B, H)


# ---------------------------------------------------------------------------
# Pure-JAX reference (for correctness check only; computes everything fully)
# ---------------------------------------------------------------------------
def _ref_lstm_dir(x_tbd, w_ih_t, w_hh_t, b, H):
    B = x_tbd.shape[1]

    def step(carry, x_t):
        h, c = carry
        gates = x_t @ w_ih_t + h @ w_hh_t + b[0]
        i = jax.nn.sigmoid(gates[:, :H])
        f = jax.nn.sigmoid(gates[:, H:2 * H])
        g = jnp.tanh(gates[:, 2 * H:3 * H])
        o = jax.nn.sigmoid(gates[:, 3 * H:4 * H])
        c = f * c + i * g
        h = o * jnp.tanh(c)
        return (h, c), h

    init = (jnp.zeros((B, H), jnp.float32), jnp.zeros((B, H), jnp.float32))
    _, hs = lax.scan(step, init, x_tbd)
    return hs


def _ref_forward(tokens, params):
    emb = params["embedding"][tokens]
    x = jnp.transpose(emb, (1, 0, 2))
    H = params["lstm"][0]["fwd"][1].shape[0]
    for layer in params["lstm"]:
        h_f = _ref_lstm_dir(x, *layer["fwd"], H)
        h_b = _ref_lstm_dir(x[::-1], *layer["bwd"], H)[::-1]
        x = jnp.concatenate([h_f, h_b], axis=-1)
    last = x[-1]
    p = params["head"]
    mu = jnp.mean(last, axis=-1, keepdims=True)
    var = jnp.mean(jnp.square(last - mu), axis=-1, keepdims=True)
    y = (last - mu) * lax.rsqrt(var + 1e-5) * p["ln_w"][0] + p["ln_b"][0]
    h1 = jnp.maximum(y @ p["w1_t"] + p["b1"][0], 0.0)
    return h1 @ p["w2_t"] + p["b2"][0]


# ---------------------------------------------------------------------------
# Deterministic parameter construction (mirrors the PyTorch module layout)
# ---------------------------------------------------------------------------
def make_params(key, vocab_size, embedding_dim, hidden_size, output_size):
    H = hidden_size
    ks = iter(jax.random.split(key, 32))

    def rnd(shape, scale=0.1):
        return (scale * jax.random.normal(next(ks), shape)).astype(jnp.float32)

    lstm_layers = []
    d_in = embedding_dim
    for _ in range(2):  # num_layers = 2
        layer = {}
        for direction in ("fwd", "bwd"):
            w_ih = rnd((4 * H, d_in))          # PyTorch weight_ih_l{k}(_reverse)
            w_hh = rnd((4 * H, H))             # PyTorch weight_hh_l{k}(_reverse)
            b_ih = rnd((4 * H,))
            b_hh = rnd((4 * H,))
            layer[direction] = (w_ih.T, w_hh.T, (b_ih + b_hh)[None, :])
        lstm_layers.append(layer)
        d_in = 2 * H                            # bidirectional output feeds layer 1

    head_params = {
        "ln_w": jnp.ones((1, 2 * H), jnp.float32),    # LayerNorm weight init = 1
        "ln_b": jnp.zeros((1, 2 * H), jnp.float32),   # LayerNorm bias init = 0
        "w1_t": rnd((H, 2 * H)).T,              # fc1: Linear(2H, H)
        "b1": rnd((H,))[None, :],
        "w2_t": rnd((output_size, H)).T,        # fc2: Linear(H, output_size)
        "b2": rnd((output_size,))[None, :],
    }

    return {
        "embedding": rnd((vocab_size, embedding_dim), 0.5),
        "lstm": lstm_layers,
        "head": head_params,
    }


# ---------------------------------------------------------------------------
if __name__ == "__main__":
    vocab_size, embedding_dim, hidden_size, output_size = 50, 16, 32, 8
    batch, seq_len = 2, 8

    root = jax.random.PRNGKey(0)
    k_params, k_tokens = jax.random.split(root)
    params = make_params(k_params, vocab_size, embedding_dim, hidden_size,
                         output_size)
    tokens = jax.random.randint(k_tokens, (batch, seq_len), 0, vocab_size,
                                dtype=jnp.int32)

    fwd = jax.jit(complex_rnn_forward)
    out = jax.block_until_ready(fwd(tokens, params))
    ref = jax.block_until_ready(_ref_forward(tokens, params))

    assert out.shape == (batch, output_size)
    assert jnp.allclose(out, ref, rtol=1e-4, atol=1e-4), "mismatch vs reference"
    print("KERNEL_OK")
</pallas_src>

<mosaic_0001>
module attributes {stable_mosaic.version = 11 : i64} {
  func.func @kernel(%arg0: memref<16x16xf32, #tpu.memory_space<vmem>>, %arg1: memref<16x128xf32, #tpu.memory_space<vmem>>, %arg2: memref<32x128xf32, #tpu.memory_space<vmem>>, %arg3: memref<1x128xf32, #tpu.memory_space<vmem>>, %arg4: memref<16x128xf32, #tpu.memory_space<vmem>>, %arg5: memref<32x128xf32, #tpu.memory_space<vmem>>, %arg6: memref<1x128xf32, #tpu.memory_space<vmem>>, %arg7: memref<8x2x32xf32, #tpu.memory_space<vmem>>, %arg8: memref<8x2x32xf32, #tpu.memory_space<vmem>>, %arg9: memref<16x128xf32, #tpu.memory_space<vmem>>, %arg10: memref<16x128xf32, #tpu.memory_space<vmem>>) attributes {dimension_semantics = [], scalar_prefetch = 0 : i64, scratch_operands = 2 : i64, tpu.core_type = #tpu.core_type<tc>} {
    %c0 = arith.constant 0 : index
    %c0_0 = arith.constant 0 : index
    %0 = vector.load %arg0[%c0, %c0_0] : memref<16x16xf32, #tpu.memory_space<vmem>>, vector<16x16xf32>
    %c0_1 = arith.constant 0 : index
    %c0_2 = arith.constant 0 : index
    %1 = vector.load %arg1[%c0_1, %c0_2] : memref<16x128xf32, #tpu.memory_space<vmem>>, vector<16x128xf32>
    %cst = arith.constant dense<0.000000e+00> : vector<16x128xf32>
    %2 = tpu.matmul %0, %1, %cst {dimension_numbers = #tpu.dot_dimension_numbers<[1], [0], [0], [1], [0, 0, 1, 1], [], []>} : vector<16x16xf32>, vector<16x128xf32>, vector<16x128xf32> -> vector<16x128xf32>
    %c0_3 = arith.constant 0 : index
    %c0_4 = arith.constant 0 : index
    %3 = vector.load %arg3[%c0_3, %c0_4] : memref<1x128xf32, #tpu.memory_space<vmem>>, vector<1x128xf32>
    %4 = vector.broadcast %3 : vector<1x128xf32> to vector<16x128xf32>
    %5 = arith.addf %2, %4 : vector<16x128xf32>
    %c0_5 = arith.constant 0 : index
    %c0_6 = arith.constant 0 : index
    %6 = vector.load %arg9[%c0_5, %c0_6] : memref<16x128xf32, #tpu.memory_space<vmem>>, vector<16x128xf32>
    tpu.vector_store %arg9[%c0_5, %c0_6], %5 {strides = array<i32>} : memref<16x128xf32, #tpu.memory_space<vmem>>, vector<16x128xf32>,
    %c0_7 = arith.constant 0 : index
    %c0_8 = arith.constant 0 : index
    %7 = vector.load %arg4[%c0_7, %c0_8] : memref<16x128xf32, #tpu.memory_space<vmem>>, vector<16x128xf32>
    %cst_9 = arith.constant dense<0.000000e+00> : vector<16x128xf32>
    %8 = tpu.matmul %0, %7, %cst_9 {dimension_numbers = #tpu.dot_dimension_numbers<[1], [0], [0], [1], [0, 0, 1, 1], [], []>} : vector<16x16xf32>, vector<16x128xf32>, vector<16x128xf32> -> vector<16x128xf32>
    %c0_10 = arith.constant 0 : index
    %c0_11 = arith.constant 0 : index
    %9 = vector.load %arg6[%c0_10, %c0_11] : memref<1x128xf32, #tpu.memory_space<vmem>>, vector<1x128xf32>
    %10 = vector.broadcast %9 : vector<1x128xf32> to vector<16x128xf32>
    %11 = arith.addf %8, %10 : vector<16x128xf32>
    %c0_12 = arith.constant 0 : index
    %c0_13 = arith.constant 0 : index
    %12 = vector.load %arg10[%c0_12, %c0_13] : memref<16x128xf32, #tpu.memory_space<vmem>>, vector<16x128xf32>
    tpu.vector_store %arg10[%c0_12, %c0_13], %11 {strides = array<i32>} : memref<16x128xf32, #tpu.memory_space<vmem>>, vector<16x128xf32>,
    %c0_14 = arith.constant 0 : index
    %c0_15 = arith.constant 0 : index
    %13 = vector.load %arg2[%c0_14, %c0_15] : memref<32x128xf32, #tpu.memory_space<vmem>>, vector<32x128xf32>
    %c0_16 = arith.constant 0 : index
    %c0_17 = arith.constant 0 : index
    %14 = vector.load %arg5[%c0_16, %c0_17] : memref<32x128xf32, #tpu.memory_space<vmem>>, vector<32x128xf32>
    %cst_18 = arith.constant 0.000000e+00 : f32
    %15 = vector.broadcast %cst_18 : f32 to vector<2x32xf32>
    %c0_i32 = arith.constant 0 : i32
    %c8_i32 = arith.constant 8 : i32
    %16 = arith.addi %c0_i32, %c8_i32 : i32
    %c1_i32 = arith.constant 1 : i32
    %17:4 = scf.for %arg11 = %c0_i32 to %16 step %c1_i32 iter_args(%arg12 = %15, %arg13 = %15, %arg14 = %15, %arg15 = %15) -> (vector<2x32xf32>, vector<2x32xf32>, vector<2x32xf32>, vector<2x32xf32>)  : i32 {
      %c7_i32 = arith.constant 7 : i32
      %18 = arith.subi %c7_i32, %arg11 : i32
      %c2_i32 = arith.constant 2 : i32
      %19 = arith.muli %arg11, %c2_i32 : i32
      %20 = tpu.assume_multiple %19, 2 : i32
      %c2_i32_20 = arith.constant 2 : i32
      %21 = arith.muli %18, %c2_i32_20 : i32
      %22 = tpu.assume_multiple %21, 2 : i32
      %23 = arith.index_cast %20 : i32 to index
      %c0_21 = arith.constant 0 : index
      %24 = vector.load %arg9[%23, %c0_21] : memref<16x128xf32, #tpu.memory_space<vmem>>, vector<2x128xf32>
      %cst_22 = arith.constant dense<0.000000e+00> : vector<2x128xf32>
      %25 = tpu.matmul %arg12, %13, %cst_22 {dimension_numbers = #tpu.dot_dimension_numbers<[1], [0], [0], [1], [0, 0, 1, 1], [], []>} : vector<2x32xf32>, vector<32x128xf32>, vector<2x128xf32> -> vector<2x128xf32>
      %26 = arith.addf %24, %25 : vector<2x128xf32>
      %27 = arith.index_cast %22 : i32 to index
      %c0_23 = arith.constant 0 : index
      %28 = vector.load %arg10[%27, %c0_23] : memref<16x128xf32, #tpu.memory_space<vmem>>, vector<2x128xf32>
      %cst_24 = arith.constant dense<0.000000e+00> : vector<2x128xf32>
      %29 = tpu.matmul %arg14, %14, %cst_24 {dimension_numbers = #tpu.dot_dimension_numbers<[1], [0], [0], [1], [0, 0, 1, 1], [], []>} : vector<2x32xf32>, vector<32x128xf32>, vector<2x128xf32> -> vector<2x128xf32>
      %30 = arith.addf %28, %29 : vector<2x128xf32>
      %31 = vector.extract_strided_slice %26 {offsets = [0, 0], sizes = [2, 32], strides = [1, 1]} : vector<2x128xf32> to vector<2x32xf32>
      %32 = arith.negf %31 : vector<2x32xf32>
      %33 = math.exp %32 : vector<2x32xf32>
      %cst_25 = arith.constant 1.000000e+00 : f32
      %34 = vector.broadcast %cst_25 : f32 to vector<2x32xf32>
      %35 = arith.addf %34, %33 : vector<2x32xf32>
      %36 = arith.divf %34, %35 : vector<2x32xf32>
      %37 = vector.extract_strided_slice %26 {offsets = [0, 32], sizes = [2, 32], strides = [1, 1]} : vector<2x128xf32> to vector<2x32xf32>
      %38 = arith.negf %37 : vector<2x32xf32>
      %39 = math.exp %38 : vector<2x32xf32>
      %cst_26 = arith.constant 1.000000e+00 : f32
      %40 = vector.broadcast %cst_26 : f32 to vector<2x32xf32>
      %41 = arith.addf %40, %39 : vector<2x32xf32>
      %42 = arith.divf %40, %41 : vector<2x32xf32>
      %43 = vector.extract_strided_slice %26 {offsets = [0, 64], sizes = [2, 32], strides = [1, 1]} : vector<2x128xf32> to vector<2x32xf32>
      %44 = math.tanh %43 : vector<2x32xf32>
      %45 = vector.extract_strided_slice %26 {offsets = [0, 96], sizes = [2, 32], strides = [1, 1]} : vector<2x128xf32> to vector<2x32xf32>
      %46 = arith.negf %45 : vector<2x32xf32>
      %47 = math.exp %46 : vector<2x32xf32>
      %cst_27 = arith.constant 1.000000e+00 : f32
      %48 = vector.broadcast %cst_27 : f32 to vector<2x32xf32>
      %49 = arith.addf %48, %47 : vector<2x32xf32>
      %50 = arith.divf %48, %49 : vector<2x32xf32>
      %51 = arith.mulf %42, %arg13 : vector<2x32xf32>
      %52 = arith.mulf %36, %44 : vector<2x32xf32>
      %53 = arith.addf %51, %52 : vector<2x32xf32>
      %54 = math.tanh %53 : vector<2x32xf32>
      %55 = arith.mulf %50, %54 : vector<2x32xf32>
      %56 = vector.extract_strided_slice %30 {offsets = [0, 0], sizes = [2, 32], strides = [1, 1]} : vector<2x128xf32> to vector<2x32xf32>
      %57 = arith.negf %56 : vector<2x32xf32>
      %58 = math.exp %57 : vector<2x32xf32>
      %cst_28 = arith.constant 1.000000e+00 : f32
      %59 = vector.broadcast %cst_28 : f32 to vector<2x32xf32>
      %60 = arith.addf %59, %58 : vector<2x32xf32>
      %61 = arith.divf %59, %60 : vector<2x32xf32>
      %62 = vector.extract_strided_slice %30 {offsets = [0, 32], sizes = [2, 32], strides = [1, 1]} : vector<2x128xf32> to vector<2x32xf32>
      %63 = arith.negf %62 : vector<2x32xf32>
      %64 = math.exp %63 : vector<2x32xf32>
      %cst_29 = arith.constant 1.000000e+00 : f32
      %65 = vector.broadcast %cst_29 : f32 to vector<2x32xf32>
      %66 = arith.addf %65, %64 : vector<2x32xf32>
      %67 = arith.divf %65, %66 : vector<2x32xf32>
      %68 = vector.extract_strided_slice %30 {offsets = [0, 64], sizes = [2, 32], strides = [1, 1]} : vector<2x128xf32> to vector<2x32xf32>
      %69 = math.tanh %68 : vector<2x32xf32>
      %70 = vector.extract_strided_slice %30 {offsets = [0, 96], sizes = [2, 32], strides = [1, 1]} : vector<2x128xf32> to vector<2x32xf32>
      %71 = arith.negf %70 : vector<2x32xf32>
      %72 = math.exp %71 : vector<2x32xf32>
      %cst_30 = arith.constant 1.000000e+00 : f32
      %73 = vector.broadcast %cst_30 : f32 to vector<2x32xf32>
      %74 = arith.addf %73, %72 : vector<2x32xf32>
      %75 = arith.divf %73, %74 : vector<2x32xf32>
      %76 = arith.mulf %67, %arg15 : vector<2x32xf32>
      %77 = arith.mulf %61, %69 : vector<2x32xf32>
      %78 = arith.addf %76, %77 : vector<2x32xf32>
      %79 = math.tanh %78 : vector<2x32xf32>
      %80 = arith.mulf %75, %79 : vector<2x32xf32>
      %81 = arith.index_cast %arg11 : i32 to index
      %c0_31 = arith.constant 0 : index
      %c0_32 = arith.constant 0 : index
      %82 = vector.load %arg7[%81, %c0_31, %c0_32] : memref<8x2x32xf32, #tpu.memory_space<vmem>>, vector<1x2x32xf32>
      %83 = vector.shape_cast %82 : vector<1x2x32xf32> to vector<2x32xf32>
      %84 = vector.shape_cast %55 : vector<2x32xf32> to vector<1x2x32xf32>
      tpu.vector_store %arg7[%81, %c0_31, %c0_32], %84 {strides = array<i32>} : memref<8x2x32xf32, #tpu.memory_space<vmem>>, vector<1x2x32xf32>,
      %85 = arith.index_cast %18 : i32 to index
      %c0_33 = arith.constant 0 : index
      %c0_34 = arith.constant 0 : index
      %86 = vector.load %arg8[%85, %c0_33, %c0_34] : memref<8x2x32xf32, #tpu.memory_space<vmem>>, vector<1x2x32xf32>
      %87 = vector.shape_cast %86 : vector<1x2x32xf32> to vector<2x32xf32>
      %88 = vector.shape_cast %80 : vector<2x32xf32> to vector<1x2x32xf32>
      tpu.vector_store %arg8[%85, %c0_33, %c0_34], %88 {strides = array<i32>} : memref<8x2x32xf32, #tpu.memory_space<vmem>>, vector<1x2x32xf32>,
      scf.yield %55, %53, %80, %78 : vector<2x32xf32>, vector<2x32xf32>, vector<2x32xf32>, vector<2x32xf32>
    }
    %c8_i32_19 = arith.constant 8 : i32
    return
  }
}

module attributes {stable_mosaic.version = 11 : i64} {
  func.func @kernel(%arg0: memref<16x32xf32, #tpu.memory_space<vmem>>, %arg1: memref<16x32xf32, #tpu.memory_space<vmem>>, %arg2: memref<32x128xf32, #tpu.memory_space<vmem>>, %arg3: memref<32x128xf32, #tpu.memory_space<vmem>>, %arg4: memref<32x128xf32, #tpu.memory_space<vmem>>, %arg5: memref<1x128xf32, #tpu.memory_space<vmem>>, %arg6: memref<32x128xf32, #tpu.memory_space<vmem>>, %arg7: memref<32x128xf32, #tpu.memory_space<vmem>>, %arg8: memref<1x128xf32, #tpu.memory_space<vmem>>, %arg9: memref<1x64xf32, #tpu.memory_space<vmem>>, %arg10: memref<1x64xf32, #tpu.memory_space<vmem>>, %arg11: memref<64x32xf32, #tpu.memory_space<vmem>>, %arg12: memref<1x32xf32, #tpu.memory_space<vmem>>, %arg13: memref<32x8xf32, #tpu.memory_space<vmem>>, %arg14: memref<1x8xf32, #tpu.memory_space<vmem>>, %arg15: memref<2x8xf32, #tpu.memory_space<vmem>>, %arg16: memref<16x128xf32, #tpu.memory_space<vmem>>) attributes {dimension_semantics = [], scalar_prefetch = 0 : i64, scratch_operands = 1 : i64, tpu.core_type = #tpu.core_type<tc>} {
    %c0 = arith.constant 0 : index
    %c0_0 = arith.constant 0 : index
    %0 = vector.load %arg0[%c0, %c0_0] : memref<16x32xf32, #tpu.memory_space<vmem>>, vector<16x32xf32>
    %c0_1 = arith.constant 0 : index
    %c0_2 = arith.constant 0 : index
    %1 = vector.load %arg2[%c0_1, %c0_2] : memref<32x128xf32, #tpu.memory_space<vmem>>, vector<32x128xf32>
    %cst = arith.constant dense<0.000000e+00> : vector<16x128xf32>
    %2 = tpu.matmul %0, %1, %cst {dimension_numbers = #tpu.dot_dimension_numbers<[1], [0], [0], [1], [0, 0, 1, 1], [], []>} : vector<16x32xf32>, vector<32x128xf32>, vector<16x128xf32> -> vector<16x128xf32>
    %c0_3 = arith.constant 0 : index
    %c0_4 = arith.constant 0 : index
    %3 = vector.load %arg1[%c0_3, %c0_4] : memref<16x32xf32, #tpu.memory_space<vmem>>, vector<16x32xf32>
    %c0_5 = arith.constant 0 : index
    %c0_6 = arith.constant 0 : index
    %4 = vector.load %arg3[%c0_5, %c0_6] : memref<32x128xf32, #tpu.memory_space<vmem>>, vector<32x128xf32>
    %cst_7 = arith.constant dense<0.000000e+00> : vector<16x128xf32>
    %5 = tpu.matmul %3, %4, %cst_7 {dimension_numbers = #tpu.dot_dimension_numbers<[1], [0], [0], [1], [0, 0, 1, 1], [], []>} : vector<16x32xf32>, vector<32x128xf32>, vector<16x128xf32> -> vector<16x128xf32>
    %6 = arith.addf %2, %5 : vector<16x128xf32>
    %c0_8 = arith.constant 0 : index
    %c0_9 = arith.constant 0 : index
    %7 = vector.load %arg5[%c0_8, %c0_9] : memref<1x128xf32, #tpu.memory_space<vmem>>, vector<1x128xf32>
    %8 = vector.broadcast %7 : vector<1x128xf32> to vector<16x128xf32>
    %9 = arith.addf %6, %8 : vector<16x128xf32>
    %c0_10 = arith.constant 0 : index
    %c0_11 = arith.constant 0 : index
    %10 = vector.load %arg16[%c0_10, %c0_11] : memref<16x128xf32, #tpu.memory_space<vmem>>, vector<16x128xf32>
    tpu.vector_store %arg16[%c0_10, %c0_11], %9 {strides = array<i32>} : memref<16x128xf32, #tpu.memory_space<vmem>>, vector<16x128xf32>,
    %c0_12 = arith.constant 0 : index
    %c0_13 = arith.constant 0 : index
    %11 = vector.load %arg4[%c0_12, %c0_13] : memref<32x128xf32, #tpu.memory_space<vmem>>, vector<32x128xf32>
    %cst_14 = arith.constant 0.000000e+00 : f32
    %12 = vector.broadcast %cst_14 : f32 to vector<2x32xf32>
    %c0_i32 = arith.constant 0 : i32
    %c8_i32 = arith.constant 8 : i32
    %13 = arith.addi %c0_i32, %c8_i32 : i32
    %c1_i32 = arith.constant 1 : i32
    %14:2 = scf.for %arg17 = %c0_i32 to %13 step %c1_i32 iter_args(%arg18 = %12, %arg19 = %12) -> (vector<2x32xf32>, vector<2x32xf32>)  : i32 {
      %c2_i32 = arith.constant 2 : i32
      %88 = arith.muli %arg17, %c2_i32 : i32
      %89 = tpu.assume_multiple %88, 2 : i32
      %90 = arith.index_cast %89 : i32 to index
      %c0_52 = arith.constant 0 : index
      %91 = vector.load %arg16[%90, %c0_52] : memref<16x128xf32, #tpu.memory_space<vmem>>, vector<2x128xf32>
      %cst_53 = arith.constant dense<0.000000e+00> : vector<2x128xf32>
      %92 = tpu.matmul %arg18, %11, %cst_53 {dimension_numbers = #tpu.dot_dimension_numbers<[1], [0], [0], [1], [0, 0, 1, 1], [], []>} : vector<2x32xf32>, vector<32x128xf32>, vector<2x128xf32> -> vector<2x128xf32>
      %93 = arith.addf %91, %92 : vector<2x128xf32>
      %94 = vector.extract_strided_slice %93 {offsets = [0, 0], sizes = [2, 32], strides = [1, 1]} : vector<2x128xf32> to vector<2x32xf32>
      %95 = arith.negf %94 : vector<2x32xf32>
      %96 = math.exp %95 : vector<2x32xf32>
      %cst_54 = arith.constant 1.000000e+00 : f32
      %97 = vector.broadcast %cst_54 : f32 to vector<2x32xf32>
      %98 = arith.addf %97, %96 : vector<2x32xf32>
      %99 = arith.divf %97, %98 : vector<2x32xf32>
      %100 = vector.extract_strided_slice %93 {offsets = [0, 32], sizes = [2, 32], strides = [1, 1]} : vector<2x128xf32> to vector<2x32xf32>
      %101 = arith.negf %100 : vector<2x32xf32>
      %102 = math.exp %101 : vector<2x32xf32>
      %cst_55 = arith.constant 1.000000e+00 : f32
      %103 = vector.broadcast %cst_55 : f32 to vector<2x32xf32>
      %104 = arith.addf %103, %102 : vector<2x32xf32>
      %105 = arith.divf %103, %104 : vector<2x32xf32>
      %106 = vector.extract_strided_slice %93 {offsets = [0, 64], sizes = [2, 32], strides = [1, 1]} : vector<2x128xf32> to vector<2x32xf32>
      %107 = math.tanh %106 : vector<2x32xf32>
      %108 = vector.extract_strided_slice %93 {offsets = [0, 96], sizes = [2, 32], strides = [1, 1]} : vector<2x128xf32> to vector<2x32xf32>
      %109 = arith.negf %108 : vector<2x32xf32>
      %110 = math.exp %109 : vector<2x32xf32>
      %cst_56 = arith.constant 1.000000e+00 : f32
      %111 = vector.broadcast %cst_56 : f32 to vector<2x32xf32>
      %112 = arith.addf %111, %110 : vector<2x32xf32>
      %113 = arith.divf %111, %112 : vector<2x32xf32>
      %114 = arith.mulf %105, %arg19 : vector<2x32xf32>
      %115 = arith.mulf %99, %107 : vector<2x32xf32>
      %116 = arith.addf %114, %115 : vector<2x32xf32>
      %117 = math.tanh %116 : vector<2x32xf32>
      %118 = arith.mulf %113, %117 : vector<2x32xf32>
      scf.yield %118, %116 : vector<2x32xf32>, vector<2x32xf32>
    }
    %c8_i32_15 = arith.constant 8 : i32
    %c14 = arith.constant 14 : index
    %c0_16 = arith.constant 0 : index
    %15 = vector.load %arg0[%c14, %c0_16] : memref<16x32xf32, #tpu.memory_space<vmem>>, vector<2x32xf32>
    %c0_17 = arith.constant 0 : index
    %c0_18 = arith.constant 0 : index
    %16 = vector.load %arg6[%c0_17, %c0_18] : memref<32x128xf32, #tpu.memory_space<vmem>>, vector<32x128xf32>
    %cst_19 = arith.constant dense<0.000000e+00> : vector<2x128xf32>
    %17 = tpu.matmul %15, %16, %cst_19 {dimension_numbers = #tpu.dot_dimension_numbers<[1], [0], [0], [1], [0, 0, 1, 1], [], []>} : vector<2x32xf32>, vector<32x128xf32>, vector<2x128xf32> -> vector<2x128xf32>
    %c14_20 = arith.constant 14 : index
    %c0_21 = arith.constant 0 : index
    %18 = vector.load %arg1[%c14_20, %c0_21] : memref<16x32xf32, #tpu.memory_space<vmem>>, vector<2x32xf32>
    %c0_22 = arith.constant 0 : index
    %c0_23 = arith.constant 0 : index
    %19 = vector.load %arg7[%c0_22, %c0_23] : memref<32x128xf32, #tpu.memory_space<vmem>>, vector<32x128xf32>
    %cst_24 = arith.constant dense<0.000000e+00> : vector<2x128xf32>
    %20 = tpu.matmul %18, %19, %cst_24 {dimension_numbers = #tpu.dot_dimension_numbers<[1], [0], [0], [1], [0, 0, 1, 1], [], []>} : vector<2x32xf32>, vector<32x128xf32>, vector<2x128xf32> -> vector<2x128xf32>
    %21 = arith.addf %17, %20 : vector<2x128xf32>
    %c0_25 = arith.constant 0 : index
    %c0_26 = arith.constant 0 : index
    %22 = vector.load %arg8[%c0_25, %c0_26] : memref<1x128xf32, #tpu.memory_space<vmem>>, vector<1x128xf32>
    %23 = vector.broadcast %22 : vector<1x128xf32> to vector<2x128xf32>
    %24 = arith.addf %21, %23 : vector<2x128xf32>
    %25 = vector.extract_strided_slice %24 {offsets = [0, 0], sizes = [2, 32], strides = [1, 1]} : vector<2x128xf32> to vector<2x32xf32>
    %26 = arith.negf %25 : vector<2x32xf32>
    %27 = math.exp %26 : vector<2x32xf32>
    %cst_27 = arith.constant 1.000000e+00 : f32
    %28 = vector.broadcast %cst_27 : f32 to vector<2x32xf32>
    %29 = arith.addf %28, %27 : vector<2x32xf32>
    %30 = arith.divf %28, %29 : vector<2x32xf32>
    %31 = vector.extract_strided_slice %24 {offsets = [0, 32], sizes = [2, 32], strides = [1, 1]} : vector<2x128xf32> to vector<2x32xf32>
    %32 = arith.negf %31 : vector<2x32xf32>
    %33 = math.exp %32 : vector<2x32xf32>
    %cst_28 = arith.constant 1.000000e+00 : f32
    %34 = vector.broadcast %cst_28 : f32 to vector<2x32xf32>
    %35 = arith.addf %34, %33 : vector<2x32xf32>
    %36 = arith.divf %34, %35 : vector<2x32xf32>
    %37 = vector.extract_strided_slice %24 {offsets = [0, 64], sizes = [2, 32], strides = [1, 1]} : vector<2x128xf32> to vector<2x32xf32>
    %38 = math.tanh %37 : vector<2x32xf32>
    %39 = vector.extract_strided_slice %24 {offsets = [0, 96], sizes = [2, 32], strides = [1, 1]} : vector<2x128xf32> to vector<2x32xf32>
    %40 = arith.negf %39 : vector<2x32xf32>
    %41 = math.exp %40 : vector<2x32xf32>
    %cst_29 = arith.constant 1.000000e+00 : f32
    %42 = vector.broadcast %cst_29 : f32 to vector<2x32xf32>
    %43 = arith.addf %42, %41 : vector<2x32xf32>
    %44 = arith.divf %42, %43 : vector<2x32xf32>
    %45 = arith.mulf %36, %12 : vector<2x32xf32>
    %46 = arith.mulf %30, %38 : vector<2x32xf32>
    %47 = arith.addf %45, %46 : vector<2x32xf32>
    %48 = math.tanh %47 : vector<2x32xf32>
    %49 = arith.mulf %44, %48 : vector<2x32xf32>
    %50 = tpu.concatenate %14#0, %49 in 1 : vector<2x32xf32>, vector<2x32xf32> -> vector<2x64xf32>
    %cst_30 = arith.constant dense<0.000000e+00> : vector<2xf32>
    %51 = vector.multi_reduction <add>, %50, %cst_30 [1] : vector<2x64xf32> to vector<2xf32>
    %52 = vector.shape_cast %51 : vector<2xf32> to vector<2x1xf32>
    %cst_31 = arith.constant 6.400000e+01 : f32
    %53 = vector.broadcast %cst_31 : f32 to vector<2x1xf32>
    %54 = arith.divf %52, %53 : vector<2x1xf32>
    %55 = vector.broadcast %54 : vector<2x1xf32> to vector<2x64xf32>
    %56 = arith.subf %50, %55 : vector<2x64xf32>
    %57 = arith.mulf %56, %56 : vector<2x64xf32>
    %cst_32 = arith.constant dense<0.000000e+00> : vector<2xf32>
    %58 = vector.multi_reduction <add>, %57, %cst_32 [1] : vector<2x64xf32> to vector<2xf32>
    %59 = vector.shape_cast %58 : vector<2xf32> to vector<2x1xf32>
    %cst_33 = arith.constant 6.400000e+01 : f32
    %60 = vector.broadcast %cst_33 : f32 to vector<2x1xf32>
    %61 = arith.divf %59, %60 : vector<2x1xf32>
    %62 = vector.broadcast %54 : vector<2x1xf32> to vector<2x64xf32>
    %63 = arith.subf %50, %62 : vector<2x64xf32>
    %cst_34 = arith.constant 9.99999974E-6 : f32
    %64 = vector.broadcast %cst_34 : f32 to vector<2x1xf32>
    %65 = arith.addf %61, %64 : vector<2x1xf32>
    %66 = math.rsqrt %65 : vector<2x1xf32>
    %67 = vector.broadcast %66 : vector<2x1xf32> to vector<2x64xf32>
    %68 = arith.mulf %63, %67 : vector<2x64xf32>
    %c0_35 = arith.constant 0 : index
    %c0_36 = arith.constant 0 : index
    %69 = vector.load %arg9[%c0_35, %c0_36] : memref<1x64xf32, #tpu.memory_space<vmem>>, vector<1x64xf32>
    %70 = vector.broadcast %69 : vector<1x64xf32> to vector<2x64xf32>
    %71 = arith.mulf %68, %70 : vector<2x64xf32>
    %c0_37 = arith.constant 0 : index
    %c0_38 = arith.constant 0 : index
    %72 = vector.load %arg10[%c0_37, %c0_38] : memref<1x64xf32, #tpu.memory_space<vmem>>, vector<1x64xf32>
    %73 = vector.broadcast %72 : vector<1x64xf32> to vector<2x64xf32>
    %74 = arith.addf %71, %73 : vector<2x64xf32>
    %c0_39 = arith.constant 0 : index
    %c0_40 = arith.constant 0 : index
    %75 = vector.load %arg11[%c0_39, %c0_40] : memref<64x32xf32, #tpu.memory_space<vmem>>, vector<64x32xf32>
    %cst_41 = arith.constant dense<0.000000e+00> : vector<2x32xf32>
    %76 = tpu.matmul %74, %75, %cst_41 {dimension_numbers = #tpu.dot_dimension_numbers<[1], [0], [0], [1], [0, 0, 1, 1], [], []>} : vector<2x64xf32>, vector<64x32xf32>, vector<2x32xf32> -> vector<2x32xf32>
    %c0_42 = arith.constant 0 : index
    %c0_43 = arith.constant 0 : index
    %77 = vector.load %arg12[%c0_42, %c0_43] : memref<1x32xf32, #tpu.memory_space<vmem>>, vector<1x32xf32>
    %78 = vector.broadcast %77 : vector<1x32xf32> to vector<2x32xf32>
    %79 = arith.addf %76, %78 : vector<2x32xf32>
    %cst_44 = arith.constant 0.000000e+00 : f32
    %80 = vector.broadcast %cst_44 : f32 to vector<2x32xf32>
    %81 = arith.maximumf %79, %80 : vector<2x32xf32>
    %c0_45 = arith.constant 0 : index
    %c0_46 = arith.constant 0 : index
    %82 = vector.load %arg13[%c0_45, %c0_46] : memref<32x8xf32, #tpu.memory_space<vmem>>, vector<32x8xf32>
    %cst_47 = arith.constant dense<0.000000e+00> : vector<2x8xf32>
    %83 = tpu.matmul %81, %82, %cst_47 {dimension_numbers = #tpu.dot_dimension_numbers<[1], [0], [0], [1], [0, 0, 1, 1], [], []>} : vector<2x32xf32>, vector<32x8xf32>, vector<2x8xf32> -> vector<2x8xf32>
    %c0_48 = arith.constant 0 : index
    %c0_49 = arith.constant 0 : index
    %84 = vector.load %arg14[%c0_48, %c0_49] : memref<1x8xf32, #tpu.memory_space<vmem>>, vector<1x8xf32>
    %85 = vector.broadcast %84 : vector<1x8xf32> to vector<2x8xf32>
    %86 = arith.addf %83, %85 : vector<2x8xf32>
    %c0_50 = arith.constant 0 : index
    %c0_51 = arith.constant 0 : index
    %87 = vector.load %arg15[%c0_50, %c0_51] : memref<2x8xf32, #tpu.memory_space<vmem>>, vector<2x8xf32>
    tpu.vector_store %arg15[%c0_50, %c0_51], %86 {strides = array<i32>} : memref<2x8xf32, #tpu.memory_space<vmem>>, vector<2x8xf32>,
    return
  }
}

</mosaic_0001>

<bundles_post_ra>
// kernel: complex_rnn_forward.2
= control target key start
LH: loop header
LB: loop body
LE: loop exit
PB: predicated region body
PF: predicated region fallthrough
CT: control target
= control target key end

     0   :  { %vm39_vm0 = vcmask 130048   ;;  %v786_v26 = vmov 0.0   ;;  %v788_v27 = vmov 0.0   ;;  %v790_v28 = vmov 0.0   ;;  %s854_s1 = inlined_call_operand.vmem [shape: f32[16,128], index: 1, kind: input, shape index: {}]   ;;  %s855_s7 = inlined_call_operand.vmem [shape: f32[8,2,32], index: 7, kind: output, shape index: {0}]   ;;  %s856_s8 = inlined_call_operand.vmem [shape: f32[8,2,32], index: 8, kind: output, shape index: {1}]   ;;  %s857_s4 = inlined_call_operand.vmem [shape: f32[16,128], index: 4, kind: input, shape index: {}]   ;;  %s858_s0 = inlined_call_operand.vmem [shape: f32[16,16], index: 0, kind: input, shape index: {}]   ;;  %s859_s2 = inlined_call_operand.vmem [shape: f32[32,128], index: 2, kind: input, shape index: {}]   ;;  %s860_s5 = inlined_call_operand.vmem [shape: f32[32,128], index: 5, kind: input, shape index: {}]   ;;  %s861_s3 = inlined_call_operand.vmem [shape: f32[1,128], index: 3, kind: input, shape index: {}]   ;;  %s862_s6 = inlined_call_operand.vmem [shape: f32[1,128], index: 6, kind: input, shape index: {}]  }
   0x1   :  { %v30_v0 = vld [vmem:[%s854_s1] sm:$0xff]  ;;  %v31_v1 = vld [vmem:[%s854_s1 + $0x8] sm:$0xff]  ;;  %v753_v10 = vld [vmem:[%s859_s2 + $0x10] sm:$0xff]  ;;  %v792_v29 = vmov 0.0  }
   0x2   :  { %v123_v2 = vld [vmem:[%s857_s4] sm:$0xff]  ;;  %v547_v3 = vpack.c.bf16 %v31_v1, %v30_v0  ;;  %v124_v4 = vld [vmem:[%s857_s4 + $0x8] sm:$0xff]  ;;  %v758_v11 = vld [vmem:[%s859_s2 + $0x18] sm:$0xff] }
   0x3   :  { %v28_v5 = vld [vmem:[%s858_s0] sm:$0xff]  ;;  %v551_v6 = vpack.c.bf16 %v124_v4, %v123_v2  ;;  %v29_v7 = vld [vmem:[%s858_s0 + $0x8] sm:$0xff]  ;;  %v773_v14 = vld [vmem:[%s860_s5 + $0x10] sm:$0xff] }
   0x4   :  { %515 = vmatprep.mubr.msk.f32.mxu0 %vm39_vm0, %v28_v5  ;;  %522 = vmatprep.mubr.msk.f32.mxu1 %vm39_vm0, %v28_v5  ;;  %v743_v8 = vld [vmem:[%s859_s2] sm:$0xff]  ;;  %v748_v9 = vld [vmem:[%s859_s2 + $0x8] sm:$0xff]  ;;  %v778_v15 = vld [vmem:[%s860_s5 + $0x18] sm:$0xff] }
   0x5   :  { %548 = vmatprep.subr.bf16.mxu0 %v547_v3  ;;  %552 = vmatprep.subr.bf16.mxu1 %v551_v6  ;;  %v763_v12 = vld [vmem:[%s860_s5] sm:$0xff]  ;;  %v768_v13 = vld [vmem:[%s860_s5 + $0x8] sm:$0xff] }
   0x6   :  { %550 = vmatpush3.bf16.msra.mxu0 %v547_v3  ;;  %554 = vmatpush3.bf16.msra.mxu1 %v551_v6  ;;  %v481_v16 = vld [vmem:[%s861_s3] ss:$0 sm:$0xff]  ;;  %s794_s3 = smov 0  }
   0x7   :  { %v484_v17 = vld [vmem:[%s862_s6] ss:$0 sm:$0xff] }
   0x9   :  { %516 = vmatmul.mubr.msk.f32.vlgmr.msra.gmra.mrb[0].mxu0 %vm39_vm0, %v29_v7  ;;  %523 = vmatmul.mubr.msk.f32.vlgmr.msra.gmra.mrb[0].mxu1 %vm39_vm0, %v29_v7 }
  0xdc   :  { %v517_v18 = vpop.f32.mrb[0].mxu0  ;;  %v524_v20 = vpop.f32.mrb[0].mxu1 }
  0xdd   :  { %v118_v19 = vadd.f32 %v517_v18, %v481_v16  ;;  %v112_v21 = vpop.f32.mrb[1].mxu0  ;;  %v204_v22 = vadd.f32 %v524_v20, %v484_v17  ;;  %v198_v24 = vpop.f32.mrb[1].mxu1 }
  0xde   :  { %v113_v23 = vadd.f32 %v481_v16, %v112_v21  ;;  %v199_v25 = vadd.f32 %v484_v17, %v198_v24 }
  0xdf   :  { %122 = vst [vmem:[#allocation2 + $0x8] sm:$0xff] %v118_v19  ;;  %208 = vst [vmem:[#allocation3 + $0x8] sm:$0xff] %v204_v22 }
  0xe0   :  { %121 = vst [vmem:[#allocation2] sm:$0xff] %v113_v23  ;;  %207 = vst [vmem:[#allocation3] sm:$0xff] %v199_v25 }
  0xe1 LB: > { %v556_v30 = vpack.c.bf16 %v748_v9, %v743_v8  ;;  %v668_v31 = vmov 0.0|0.0   ;;  %v562_v32 = vpack.c.bf16 %v768_v13, %v763_v12  ;;  %s669_s5 = smov 32   ;;  %v559_v33 = vpack.c.bf16 %v758_v11, %v753_v10  ;;  %s487_s6 = sshll.u32 %s666_s3, 1  ;;  %s666_s3 = sphi %s794_s3, %s222_s3   ;;  %v662_v29 = vphi %v792_v29, %v410_v29   ;;  %v658_v28 = vphi %v790_v28, %v404_v28   ;;  %v654_v27 = vphi %v788_v27, %v434_v27   ;;  %v650_v26 = vphi %v786_v26, %v428_v26  }
  0xe2   : > { %555 = vmatprep.subr.bf16.mxu0 %v668_v31  ;;  %561 = vmatprep.subr.bf16.mxu1 %v668_v31  ;;  %v565_v34 = vpack.c.bf16 %v778_v15, %v773_v14  ;;  %vm670_vm1 = vmmov 0   ;;  %v671_v35 = vmov 0.0   ;;  %vm235_vm2 = vcmask 261120   ;;  %s227_s11 = ssub.s32 7, %s666_s3  ;;  %s230_s13 = scalar_lea.vmem [#allocation2], %s487_s6 }
  0xe3   : > { %233 = vrot.lane.b32.xlu0 %v662_v29, %s669_s5  ;;  %557 = vmatpush3.bf16.msra.mxu0 %v556_v30  ;;  %s819_s12 = sshll.u32 %s227_s11, 1  ;;  %s672_s1 = smov 64   ;;  %vm440_vm3 = vcmask 254976  }
  0xe4   : > { %558 = vmatprep.subr.bf16.mxu0 %v668_v31  ;;  %563 = vmatpush3.bf16.msra.mxu1 %v562_v32  ;;  %s309_s14 = scalar_lea.vmem [#allocation3], %s819_s12  ;;  %s439_s16 = scalar_lea.vmem %s855_s7, %s487_s6 }
  0xe5   : > { %533 = vmatprep.mubr.msk.f32.mxu0 %vm670_vm1, %v671_v35  ;;  %564 = vmatprep.subr.bf16.mxu1 %v668_v31  ;;  %s446_s19 = scalar_lea.vmem %s856_s8, %s819_s12  ;;  %s222_s3 = sadd.s32 1, %s666_s3  }
  0xe6   : > { %544 = vmatprep.mubr.msk.f32.mxu1 %vm670_vm1, %v671_v35  ;;  %p219_p0 = scmp.ge.s32.totalorder %s222_s3, 8  }
  0xe7   : > { %312 = vrot.lane.b32.xlu0 %v654_v27, %s669_s5  ;;  %560 = vmatpush3.bf16.msra.mxu0 %v559_v33  ;;  %v231_v38 = vld [vmem:[%s230_s13] sm:$0x3] }
  0xe8   : > { %566 = vmatpush3.bf16.msra.mxu1 %v565_v34  ;;  %v310_v42 = vld [vmem:[%s309_s14] sm:$0x3] }
 0x155   : > { %v234_v36 = vpop.permute.xlu0 %233 }
 0x156   : > { %534 = vmatmul.mubr.msk.f32.vlgmr.msra.gmra.mrb[0].mxu0 %vm235_vm2, %v234_v36 }
 0x159   : > { %v313_v37 = vpop.permute.xlu0 %312 }
 0x15a   : > { %545 = vmatmul.mubr.msk.f32.vlgmr.msra.gmra.mrb[0].mxu1 %vm235_vm2, %v313_v37 }
 0x229   : > { %v304_v39 = vpop.f32.mrb[0].mxu0 }
 0x22a   : > { %v308_v40 = vadd.f32 %v304_v39, %v231_v38  ;;  %v535_v41 = vpop.f32.mrb[1].mxu0 }
 0x22c   : > { %612 = vtanh.f32 %v308_v40  ;;  %v491_v48 = vmul.f32 -1.442695, %v308_v40 }
 0x22d   : > { %v382_v43 = vpop.f32.mrb[0].mxu1 }
 0x22e   : > { %v386_v44 = vadd.f32 %v382_v43, %v310_v42  ;;  %v546_v45 = vpop.f32.mrb[1].mxu1 }
 0x230   : > { %614 = vtanh.f32 %v386_v44  ;;  %v492_v49 = vmul.f32 -1.442695, %v386_v44 }
 0x231   : > { %616 = vpow2.f32 %v491_v48 }
 0x232   : > { %618 = vpow2.f32 %v492_v49 }
 0x236   : > { %v613_v46 = vpop.eup %612 }
 0x237   : > { %396 = vrot.lane.b32.xlu1 %v613_v46, %s672_s1 }
 0x23a   : > { %v615_v47 = vpop.eup %614 }
 0x23b   : > { %420 = vrot.lane.b32.xlu1 %v615_v47, %s672_s1  ;;  %v617_v50 = vpop.eup %616 }
 0x23c   : > { %v390_v51 = vadd.f32 1.0, %v617_v50  ;;  %v619_v52 = vpop.eup %618 }
 0x23d   : > { %v414_v53 = vadd.f32 1.0, %v619_v52 }
 0x23e   : > { %620 = vrcp.f32 %v390_v51 }
 0x23f   : > { %622 = vrcp.f32 %v414_v53 }
 0x248   : > { %v621_v54 = vpop.eup %620 }
 0x249   : > { %v623_v57 = vpop.eup %622  ;;  %v394_v60 = vmul.f32 %v658_v28, %v621_v54 }
 0x24a   : > { %v418_v62 = vmul.f32 %v650_v26, %v623_v57 }
 0x2a9   : > { %v397_v55 = vpop.permute.xlu1 %396 }
 0x2aa   : > { %v399_v56 = vmul.f32 %v621_v54, %v397_v55 }
 0x2ac   : > { %401 = vrot.lane.b32.xlu0 %v399_v56, %s669_s5 }
 0x2ad   : > { %v421_v58 = vpop.permute.xlu1 %420 }
 0x2ae   : > { %v423_v59 = vmul.f32 %v623_v57, %v421_v58 }
 0x2b0   : > { %425 = vrot.lane.b32.xlu1 %v423_v59, %s669_s5 }
 0x31e   : > { %v402_v61 = vpop.permute.xlu0 %401 }
 0x31f   : > { %v404_v28 = vadd.f32 %v402_v61, %v394_v60  }
 0x321   : > { %624 = vtanh.f32 %v404_v28 }
 0x322   : > { %v426_v63 = vpop.permute.xlu1 %425 }
 0x323   : > { %v428_v26 = vadd.f32 %v426_v63, %v418_v62  }
 0x325   : > { %626 = vtanh.f32 %v428_v26 }
 0x32b   : > { %v625_v0 = vpop.eup %624 }
 0x32c   : > { %407 = vrot.lane.b32.xlu0 %v625_v0, %s672_s1 }
 0x32f   : > { %v627_v1 = vpop.eup %626 }
 0x330   : > { %431 = vrot.lane.b32.xlu1 %v627_v1, %s672_s1 }
 0x39e   : > { %v408_v2 = vpop.permute.xlu0 %407 }
 0x39f   : > { %v410_v29 = vmul.f32 %v621_v54, %v408_v2  }
 0x3a1   : > { %436 = vrot.lane.b32.xlu0 %v410_v29, %s669_s5 }
 0x3a2   : > { %v432_v3 = vpop.permute.xlu1 %431 }
 0x3a3   : > { %v434_v27 = vmul.f32 %v623_v57, %v432_v3  }
 0x3a5   : > { %443 = vrot.lane.b32.xlu1 %v434_v27, %s669_s5 }
 0x412   :  { %221 = sbr.rel (!%p219_p0) target bundleno = 225 (0xe1), region = 67 }
 0x413   : > { %v437_v4 = vpop.permute.xlu0 %436 }
 0x414   : > { %441 = vst.msk [vmem:[%s439_s16] sm:$0x3] %vm440_vm3, %v437_v4 }
 0x417   : > { %v444_v5 = vpop.permute.xlu1 %443 }
 0x418   : > { %447 = vst.msk [vmem:[%s446_s19] sm:$0x3] %vm440_vm3, %v444_v5 }

// kernel: complex_rnn_forward.3
= control target key start
LH: loop header
LB: loop body
LE: loop exit
PB: predicated region body
PF: predicated region fallthrough
CT: control target
= control target key end

     0   :  { %20 = vsyncpa [#allocation4], 0  ;;  %vm63_vm0 = vcmask 261120   ;;  %v1070_v29 = vmov 0.0   ;;  %v1074_v30 = vmov 0.0   ;;  %s1236_s20 = smov 0   ;;  %s1365_s0 = inlined_call_operand.vmem [shape: f32[16,32], index: 0, kind: input, shape index: {}]   ;;  %s1366_s1 = inlined_call_operand.vmem [shape: f32[16,32], index: 1, kind: input, shape index: {}]   ;;  %s1367_s2 = inlined_call_operand.vmem [shape: f32[32,128], index: 2, kind: input, shape index: {}]   ;;  %s1368_s3 = inlined_call_operand.vmem [shape: f32[32,128], index: 3, kind: input, shape index: {}]   ;;  %s1369_s4 = inlined_call_operand.vmem [shape: f32[32,128], index: 4, kind: input, shape index: {}]   ;;  %s1370_s5 = inlined_call_operand.vmem [shape: f32[1,128], index: 5, kind: input, shape index: {}]   ;;  %s1371_s6 = inlined_call_operand.vmem [shape: f32[32,128], index: 6, kind: input, shape index: {}]   ;;  %s1372_s7 = inlined_call_operand.vmem [shape: f32[32,128], index: 7, kind: input, shape index: {}]   ;;  %s1373_s8 = inlined_call_operand.vmem [shape: f32[1,128], index: 8, kind: input, shape index: {}]   ;;  %s1374_s9 = inlined_call_operand.vmem [shape: f32[1,64], index: 9, kind: input, shape index: {}]   ;;  %s1375_s10 = inlined_call_operand.vmem [shape: f32[1,64], index: 10, kind: input, shape index: {}]   ;;  %s1376_s11 = inlined_call_operand.vmem [shape: f32[64,32], index: 11, kind: input, shape index: {}]   ;;  %s1377_s12 = inlined_call_operand.vmem [shape: f32[1,32], index: 12, kind: input, shape index: {}]   ;;  %s1378_s13 = inlined_call_operand.vmem [shape: f32[32,8], index: 13, kind: input, shape index: {}]   ;;  %s1379_s14 = inlined_call_operand.vmem [shape: f32[1,8], index: 14, kind: input, shape index: {}]   ;;  %s1380_s15 = inlined_call_operand.hbm [shape: f32[2,8], index: 15, kind: output, shape index: {}]  }
   0x1   :  { %v59_v0 = vld [vmem:[%s1368_s3] sm:$0xff]  ;;  %v60_v1 = vld [vmem:[%s1368_s3 + $0x8] sm:$0xff]  ;;  %v61_v5 = vld [vmem:[%s1368_s3 + $0x10] sm:$0xff] }
   0x2   :  { %v927_v2 = vpack.c.bf16 %v60_v1, %v59_v0  ;;  %v53_v3 = vld [vmem:[%s1367_s2] sm:$0xff]  ;;  %v54_v4 = vld [vmem:[%s1367_s2 + $0x8] sm:$0xff]  ;;  %v62_v7 = vld [vmem:[%s1368_s3 + $0x18] sm:$0xff] }
   0x3   :  { %v935_v6 = vpack.c.bf16 %v54_v4, %v53_v3  ;;  %v55_v8 = vld [vmem:[%s1367_s2 + $0x10] sm:$0xff]  ;;  %v56_v9 = vld [vmem:[%s1367_s2 + $0x18] sm:$0xff]  ;;  %v931_v10 = vpack.c.bf16 %v62_v7, %v61_v5  ;;  %v57_v12 = vld [vmem:[%s1366_s1] sm:$0xff] }
   0x4   :  { %928 = vmatprep.subr.bf16.mxu1 %v927_v2  ;;  %v939_v11 = vpack.c.bf16 %v56_v9, %v55_v8  ;;  %v51_v13 = vld [vmem:[%s1365_s0] sm:$0xff]  ;;  %850 = vmatprep.mubr.msk.f32.mxu1 %vm63_vm0, %v57_v12  ;;  %v58_v14 = vld [vmem:[%s1366_s1 + $0x8] sm:$0xff]  ;;  %v1226_v18 = vld [vmem:[%s1369_s4 + $0x10] sm:$0xff] }
   0x5   :  { %936 = vmatprep.subr.bf16.mxu0 %v935_v6  ;;  %930 = vmatpush3.bf16.msra.mxu1 %v927_v2  ;;  %v52_v15 = vld [vmem:[%s1365_s0 + $0x8] sm:$0xff]  ;;  %v1216_v16 = vld [vmem:[%s1369_s4] sm:$0xff]  ;;  %v1231_v19 = vld [vmem:[%s1369_s4 + $0x18] sm:$0xff] }
   0x6   :  { %938 = vmatpush3.bf16.msra.mxu0 %v935_v6  ;;  %932 = vmatprep.subr.bf16.mxu1 %v931_v10  ;;  %v1221_v17 = vld [vmem:[%s1369_s4 + $0x8] sm:$0xff]  ;;  %v787_v22 = vld [vmem:[%s1370_s5] ss:$0 sm:$0xff] }
   0x7   :  { %940 = vmatprep.subr.bf16.mxu0 %v939_v11  ;;  %861 = vmatprep.mubr.msk.f32.mxu0 %vm63_vm0, %v51_v13 }
   0x9   :  { %934 = vmatpush3.bf16.msra.mxu1 %v931_v10 }
   0xa   :  { %942 = vmatpush3.bf16.msra.mxu0 %v939_v11 }
   0xc   :  { %851 = vmatmul.mubr.msk.f32.vlgmr.msra.gmra.mrb[0].mxu1 %vm63_vm0, %v58_v14 }
   0xd   :  { %862 = vmatmul.mubr.msk.f32.vlgmr.msra.gmra.mrb[0].mxu0 %vm63_vm0, %v52_v15 }
  0xdf   :  { %v852_v20 = vpop.f32.mrb[0].mxu1 }
  0xe0   :  { %v863_v21 = vpop.f32.mrb[0].mxu0  ;;  %v136_v23 = vpop.f32.mrb[1].mxu1 }
  0xe1   :  { %v223_v24 = vadd.f32 %v863_v21, %v852_v20  ;;  %v217_v25 = vpop.f32.mrb[1].mxu0 }
  0xe2   :  { %v218_v26 = vadd.f32 %v217_v25, %v136_v23 }
  0xe3   :  { %v234_v27 = vadd.f32 %v787_v22, %v223_v24 }
  0xe4   :  { %v233_v28 = vadd.f32 %v787_v22, %v218_v26 }
  0xe5   :  { %236 = vst [vmem:[#allocation2 + $0x8] sm:$0xff] %v234_v27 }
  0xe6   :  { %235 = vst [vmem:[#allocation2] sm:$0xff] %v233_v28 }
  0xe7 LB: > { %v944_v31 = vpack.c.bf16 %v1221_v17, %v1216_v16  ;;  %v1082_v32 = vmov 0.0|0.0   ;;  %s1083_s4 = smov 32   ;;  %v947_v33 = vpack.c.bf16 %v1231_v19, %v1226_v18  ;;  %vm1084_vm1 = vmmov 0   ;;  %s788_s5 = sshll.u32 %s1080_s20, 1  ;;  %s1080_s20 = sphi %s1236_s20, %s246_s20   ;;  %v1076_v30 = vphi %v1074_v30, %v1075_v30   ;;  %v1072_v29 = vphi %v1070_v29, %v345_v29  }
  0xe8   : > { %943 = vmatprep.subr.bf16.mxu0 %v1082_v32  ;;  %253 = vrot.lane.b32.xlu0 %v1076_v30, %s1083_s4  ;;  %v1085_v34 = vmov 0.0   ;;  %s250_s21 = scalar_lea.vmem [#allocation2], %s788_s5  ;;  %s1086_s3 = smov 64  }
  0xe9   : > { %945 = vmatpush3.bf16.msra.mxu0 %v944_v31  ;;  %872 = vmatprep.mubr.msk.f32.mxu0 %vm1084_vm1, %v1085_v34  ;;  %s246_s20 = sadd.s32 1, %s1080_s20  }
  0xea   : > { %946 = vmatprep.subr.bf16.mxu0 %v1082_v32  ;;  %p243_p0 = scmp.ge.s32.totalorder %s246_s20, 8  }
  0xeb   :  { %v358_v52 = vld [vmem:[%s1372_s7] sm:$0xff] (%p243_p0)  ;;  %v359_v53 = vld [vmem:[%s1372_s7 + $0x8] sm:$0xff] (%p243_p0)  ;;  %v1087_v55 = vmov (%p243_p0), 0.0|0.0   ;;  %v360_v58 = vld [vmem:[%s1372_s7 + $0x10] sm:$0xff] (%p243_p0)  ;;  %vm1088_vm2 = vmmov (%p243_p0), 0   ;;  %v1089_v63 = vmov (%p243_p0), 0.0  }
  0xec   :  { %v353_v54 = vld [vmem:[%s1371_s6] sm:$0xff] (%p243_p0)  ;;  %955 = vmatprep.subr.bf16.mxu1 (%p243_p0), %v1087_v55  ;;  %v950_v56 = vpack.c.bf16 (%p243_p0), %v359_v53, %v358_v52  ;;  %v354_v57 = vld [vmem:[%s1371_s6 + $0x8] sm:$0xff] (%p243_p0)  ;;  %v361_v59 = vld [vmem:[%s1372_s7 + $0x18] sm:$0xff] (%p243_p0)  ;;  %894 = vmatprep.mubr.msk.f32.mxu1 (%p243_p0), %vm1088_vm2, %v1089_v63  ;;  %s1091_s2 = smov (%p243_p0), 32   ;;  %vm549_vm3 = vcmask (%p243_p0), 517120   ;;  %vm595_vm4 = vcmask (%p243_p0), 523264  }
  0xed   : > { %948 = vmatpush3.bf16.msra.mxu0 %v947_v33  ;;  %v251_v36 = vld [vmem:[%s250_s21] sm:$0x3]  ;;  %v956_v60 = vpack.c.bf16 (%p243_p0), %v354_v57, %v353_v54  ;;  %v355_v61 = vld [vmem:[%s1371_s6 + $0x10] sm:$0xff] (%p243_p0)  ;;  %v356_v62 = vld [vmem:[%s1371_s6 + $0x18] sm:$0xff] (%p243_p0)  ;;  %v953_v0 = vpack.c.bf16 (%p243_p0), %v361_v59, %v360_v58  ;;  %s1092_s26 = smov (%p243_p0), [#allocation3]   ;;  %vm754_vm5 = vcmask (%p243_p0), 58368  }
  0xee   :  { %949 = vmatprep.subr.bf16.mxu0 (%p243_p0), %v1087_v55  ;;  %v959_v1 = vpack.c.bf16 (%p243_p0), %v356_v62, %v355_v61  ;;  %v357_v2 = vld [vmem:[%s1366_s1 + $0xe] sm:$0x3] (%p243_p0)  ;;  %v793_v6 = vld [vmem:[%s1373_s8] ss:$0 sm:$0xff] (%p243_p0)  ;;  %v673_v58 = vld [vmem:[%s1378_s13 + $0x18] sm:$0xff] (%p243_p0)  ;;  %s762_s27 = sshll.u32 (%p243_p0), %s1092_s26, 4  ;;  %s763_s27 = int_to_ptr.vmem [resolvable:$true] %s762_s27 }
  0xef   :  { %957 = vmatpush3.bf16.msra.mxu1 (%p243_p0), %v956_v60  ;;  %v352_v3 = vld [vmem:[%s1365_s0 + $0xe] sm:$0x3] (%p243_p0)  ;;  %s1090_s0 = smov (%p243_p0), 64   ;;  %v580_v33 = vld [vmem:[%s1376_s11] sm:$0xff] (%p243_p0)  ;;  %p1039_p2 = scmp.lt.s32.totalorder (%p243_p0), %s763_s27, %s763_s27 }
  0xf0   :  { %958 = vmatprep.subr.bf16.mxu1 (%p243_p0), %v1087_v55  ;;  %v581_v34 = vld [vmem:[%s1376_s11 + $0x8] sm:$0xff] (%p243_p0)  ;;  %v795_v52 = vld [vmem:[%s1374_s9] ss:$0 sm:$0xff] (%p243_p0) }
  0xf1   :  { %v796_v54 = vld [vmem:[%s1375_s10] ss:$0 sm:$0xff] (%p243_p0) }
  0xf2   :  { %v797_v60 = vld [vmem:[%s1377_s12] ss:$0 sm:$0xff] (%p243_p0) }
  0xf3   :  { %960 = vmatpush3.bf16.msra.mxu1 (%p243_p0), %v959_v1  ;;  %v799_v1 = vld [vmem:[%s1379_s14] ss:$0 sm:$0xff] (%p243_p0) }
  0xf4   :  { %973 = vmatprep.subr.bf16.mxu1 (%p243_p0), %v1087_v55 }
  0xf6   :  { %895 = vmatmul.mubr.msk.f32.vlgmr.msra.gmra.mrb[0].mxu1 (%p243_p0), %vm63_vm0, %v352_v3 }
  0xf7   :  { %924 = vmatprep.mubr.msk.f32.mxu1 (%p243_p0), %vm1088_vm2, %v1089_v63 }
 0x15a   : > { %v254_v35 = vpop.permute.xlu0 %253 }
 0x15b   : > { %873 = vmatmul.mubr.msk.f32.vlgmr.msra.gmra.mrb[0].mxu0 %vm63_vm0, %v254_v35  ;;  %v962_v35 = vpack.c.bf16 (%p243_p0), %v581_v34, %v580_v33 }
 0x15c   :  { %883 = vmatprep.mubr.msk.f32.mxu0 (%p243_p0), %vm1088_vm2, %v1089_v63  ;;  %951 = vmatpush3.bf16.msra.mxu0 (%p243_p0), %v950_v56 }
 0x15d   :  { %952 = vmatprep.subr.bf16.mxu0 (%p243_p0), %v1087_v55 }
 0x160   :  { %954 = vmatpush3.bf16.msra.mxu0 (%p243_p0), %v953_v0 }
 0x161   :  { %961 = vmatprep.subr.bf16.mxu0 (%p243_p0), %v1087_v55 }
 0x1c9   :  { %v504_v5 = vpop.f32.mrb[0].mxu1 (%p243_p0) }
 0x1ca   :  { %v896_v9 = vpop.f32.mrb[1].mxu1 (%p243_p0) }
 0x22e   : > { %v323_v37 = vpop.f32.mrb[0].mxu0 }
 0x22f   : > { %v327_v38 = vadd.f32 %v323_v37, %v251_v36  ;;  %v874_v39 = vpop.f32.mrb[1].mxu0  ;;  %884 = vmatmul.mubr.msk.f32.vlgmr.msra.gmra.mrb[0].mxu0 (%p243_p0), %vm63_vm0, %v357_v2  ;;  %v582_v36 = vld [vmem:[%s1376_s11 + $0x10] sm:$0xff] (%p243_p0)  ;;  %v583_v37 = vld [vmem:[%s1376_s11 + $0x18] sm:$0xff] (%p243_p0) }
 0x230   :  { %913 = vmatprep.mubr.msk.f32.mxu0 (%p243_p0), %vm1088_vm2, %v1089_v63  ;;  %963 = vmatpush3.bf16.msra.mxu0 (%p243_p0), %v962_v35  ;;  %v584_v39 = vld [vmem:[%s1376_s11 + $0x20] sm:$0xff] (%p243_p0) }
 0x231   : > { %1016 = vtanh.f32 %v327_v38  ;;  %v790_v41 = vmul.f32 -1.442695, %v327_v38  ;;  %964 = vmatprep.subr.bf16.mxu0 (%p243_p0), %v1087_v55  ;;  %v965_v38 = vpack.c.bf16 (%p243_p0), %v583_v37, %v582_v36 }
 0x233   : > { %1018 = vpow2.f32 %v790_v41 }
 0x234   :  { %966 = vmatpush3.bf16.msra.mxu0 (%p243_p0), %v965_v38 }
 0x235   :  { %967 = vmatprep.subr.bf16.mxu0 (%p243_p0), %v1087_v55 }
 0x23b   : > { %v1017_v40 = vpop.eup %1016 }
 0x23c   : > { %337 = vrot.lane.b32.xlu0 %v1017_v40, %s1086_s3  ;;  %v585_v40 = vld [vmem:[%s1376_s11 + $0x28] sm:$0xff] (%p243_p0) }
 0x23d   : > { %v1019_v42 = vpop.eup %1018  ;;  %v968_v41 = vpack.c.bf16 (%p243_p0), %v585_v40, %v584_v39 }
 0x23e   : > { %v331_v43 = vadd.f32 1.0, %v1019_v42  ;;  %v586_v42 = vld [vmem:[%s1376_s11 + $0x30] sm:$0xff] (%p243_p0) }
 0x23f   :  { %969 = vmatpush3.bf16.msra.mxu0 (%p243_p0), %v968_v41 }
 0x240   : > { %1020 = vrcp.f32 %v331_v43  ;;  %970 = vmatprep.subr.bf16.mxu0 (%p243_p0), %v1087_v55  ;;  %v587_v43 = vld [vmem:[%s1376_s11 + $0x38] sm:$0xff] (%p243_p0) }
 0x24a   : > { %v1021_v44 = vpop.eup %1020 }
 0x24b   : > { %v335_v47 = vmul.f32 %v1072_v29, %v1021_v44 }
 0x2ae   : > { %v338_v45 = vpop.permute.xlu0 %337 }
 0x2af   : > { %v340_v46 = vmul.f32 %v1021_v44, %v338_v45  ;;  %v670_v45 = vld [vmem:[%s1378_s13] sm:$0xff] (%p243_p0) }
 0x2b1   : > { %342 = vrot.lane.b32.xlu1 %v340_v46, %s1083_s4  ;;  %v671_v46 = vld [vmem:[%s1378_s13 + $0x8] sm:$0xff] (%p243_p0) }
 0x302   :  { %v431_v4 = vpop.f32.mrb[0].mxu0 (%p243_p0) }
 0x303   :  { %v885_v7 = vpop.f32.mrb[1].mxu0 (%p243_p0)  ;;  %v505_v8 = vadd.f32 (%p243_p0), %v504_v5, %v431_v4 }
 0x305   :  { %v515_v10 = vadd.f32 (%p243_p0), %v793_v6, %v505_v8 }
 0x307   :  { %v794_v12 = vmul.f32 (%p243_p0), -1.442695, %v515_v10 }
 0x323   : > { %v343_v48 = vpop.permute.xlu1 %342 }
 0x324   : > { %v345_v29 = vadd.f32 %v343_v48, %v335_v47   ;;  %v974_v47 = vpack.c.bf16 (%p243_p0), %v671_v46, %v670_v45 }
 0x326   : > { %1022 = vtanh.f32 %v345_v29  ;;  %975 = vmatpush3.bf16.msra.mxu1 (%p243_p0), %v974_v47 }
 0x327   :  { %1024 = vtanh.f32 (%p243_p0), %v515_v10  ;;  %976 = vmatprep.subr.bf16.mxu1 (%p243_p0), %v1087_v55  ;;  %v672_v55 = vld [vmem:[%s1378_s13 + $0x10] sm:$0xff] (%p243_p0)  ;;  %s1034_s13 = scalar_lea.vmem (%p243_p0), %s763_s27, 32 }
 0x328   :  { %1026 = vpow2.f32 (%p243_p0), %v794_v12  ;;  %v977_v59 = vpack.c.bf16 (%p243_p0), %v673_v58, %v672_v55  ;;  %p1035_p1 = scmp.ne.s32.totalorder (%p243_p0), %s763_s27, %s1034_s13  ;;  %p1040_p3 = scmp.lt.s32.totalorder (%p243_p0), %s1034_s13, %s1034_s13 }
 0x32a   :  { %978 = vmatpush3.bf16.msra.mxu1 (%p243_p0), %v977_v59  ;;  %p1041_p4 = por (%p243_p0), %p1040_p3, %p1039_p2 }
 0x32c   :  { %p1042_p5 = pnand (%p243_p0), %p1041_p4, %p1035_p1 }
 0x330   : > { %v1023_v49 = vpop.eup %1022 }
 0x331   : > { %348 = vrot.lane.b32.xlu1 %v1023_v49, %s1086_s3  ;;  %v1025_v11 = vpop.eup (%p243_p0), %1024 }
 0x332   :  { %525 = vrot.lane.b32.xlu0 (%p243_p0), %v1025_v11, %s1090_s0  ;;  %v1027_v13 = vpop.eup (%p243_p0), %1026 }
 0x333   :  { %v519_v14 = vadd.f32 (%p243_p0), 1.0, %v1027_v13 }
 0x335   :  { %1028 = vrcp.f32 (%p243_p0), %v519_v14 }
 0x33f   :  { %v1029_v15 = vpop.eup (%p243_p0), %1028 }
 0x340   :  { %v523_v18 = vmul.f32 (%p243_p0), 0.0, %v1029_v15 }
 0x3a1   :  { %245 = sbr.rel (!%p243_p0) target bundleno = 231 (0xe7), region = 88 }
 0x3a3   : > { %v349_v50 = vpop.permute.xlu1 %348 }
 0x3a4   : > { %v1247_v30 = vmul.f32 %v1021_v44, %v349_v50   ;;  %v526_v16 = vpop.permute.xlu0 (%p243_p0), %525  ;;  %v971_v44 = vpack.c.bf16 (%p243_p0), %v587_v43, %v586_v42 }
 0x3a5   :  { %v528_v17 = vmul.f32 (%p243_p0), %v1029_v15, %v526_v16 }
 0x3a6   : > { %v1381_v51 = vmov %v1247_v30  ;;  %972 = vmatpush3.bf16.msra.mxu0 (%p243_p0), %v971_v44 }
 0x3a7   : > { %v1075_v30 = vmov %v1381_v51   ;;  %530 = vrot.lane.b32.xlu0 (%p243_p0), %v528_v17, %s1091_s2 }
 0x419   :  { %v531_v19 = vpop.permute.xlu0 %530 }
 0x41a   :  { %v533_v20 = vadd.f32 %v531_v19, %v523_v18 }
 0x41c   :  { %1030 = vtanh.f32 %v533_v20 }
 0x426   :  { %v1031_v21 = vpop.eup %1030 }
 0x427   :  { %536 = vrot.lane.b32.xlu1 %v1031_v21, %s1090_s0 }
 0x42b   :  { %541 = vrot.lane.b32.xlu1 %v1381_v51, %s1091_s2 }
 0x499   :  { %v537_v22 = vpop.permute.xlu1 %536 }
 0x49a   :  { %v539_v23 = vmul.f32 %v1029_v15, %v537_v22 }
 0x49c   :  { %545 = vrot.lane.b32.xlu0 %v539_v23, %s1090_s0 }
 0x49d   :  { %v542_v24 = vpop.permute.xlu1 %541 }
 0x50e   :  { %v546_v25 = vpop.permute.xlu0 %545 }
 0x50f   :  { %v548_v26 = vsel %vm63_vm0, %v542_v24, %v546_v25 }
 0x510   :  { %v550_v27 = vsel %vm549_vm3, %v548_v26, 0.0 }
 0x511   :  { %551 = vadd.xlane.f32.xlu1 %v550_v27 }
 0x59e   :  { %v552_v28 = vpop.xlane.xlu1 %551 }
 0x59f   :  { %v554_v29 = vmul.f32 0.015625, %v552_v28 }
 0x5a1   :  { %v555_v30 = vsub.f32 %v548_v26, %v554_v29 }
 0x5a3   :  { %v556_v31 = vmul.f32 %v555_v30, %v555_v30 }
 0x5a5   :  { %v557_v32 = vsel %vm549_vm3, %v556_v31, 0.0 }
 0x5a6   :  { %558 = vadd.xlane.f32.xlu0 %v557_v32 }
 0x633   :  { %v559_v48 = vpop.xlane.xlu0 %558 }
 0x634   :  { %v560_v49 = vmul.f32 0.015625, %v559_v48 }
 0x636   :  { %v561_v50 = vadd.f32 1e-05, %v560_v49 }
 0x638   :  { %1032 = vrsqrt.f32 %v561_v50 }
 0x642   :  { %v1033_v51 = vpop.eup %1032 }
 0x643   :  { %v563_v53 = vmul.f32 %v1033_v51, %v555_v30 }
 0x645   :  { %v571_v56 = vmul.f32 %v795_v52, %v563_v53 }
 0x647   :  { %v579_v57 = vadd.f32 %v796_v54, %v571_v56 }
 0x649   :  { %914 = vmatmul.mubr.msk.f32.vlgmr.msra.gmra.mrb[2].mxu0 %vm595_vm4, %v579_v57 }
 0x71c   :  { %v665_v61 = vpop.f32.mrb[2].mxu0 }
 0x71d   :  { %v666_v62 = vadd.f32 %v797_v60, %v665_v61  ;;  %v915_v63 = vpop.f32.mrb[3].mxu0 }
 0x71f   :  { %v669_v0 = vmax.f32 %v666_v62, 0.0 }
 0x721   :  { %925 = vmatmul.mubr.msk.f32.vlgmr.msra.gmra.mrb[2].mxu1 %vm63_vm0, %v669_v0 }
 0x7f4   :  { %v750_v2 = vpop.f32.mrb[2].mxu1 }
 0x7f5   :  { %v751_v3 = vadd.f32 %v799_v1, %v750_v2  ;;  %v926_v4 = vpop.f32.mrb[3].mxu1 }
 0x7f7   :  { %755 = vst.msk [vmem:[#allocation3] sm:$0x3] %vm754_vm5, %v751_v3 }
 0x7f8   :  { %1045 = shalt.err (!%p1042_p5)
}
 0x7f9   :  { %s1046_s29 = scalar_lea.hbm %s1380_s15, 32 }
 0x7fa   :  { %p1047_p6 = scmp.ne.s32.totalorder %s1380_s15, %s1046_s29  ;;  %p1050_p7 = scmp.lt.u32.totalorder %s1046_s29, %s1380_s15 }
 0x7fc   :  { %p1052_p8 = pnand %p1050_p7, %p1047_p6 }
 0x7fe   :  { %1055 = shalt.err (!%p1052_p8)
}
 0x7ff   :  { %765 = dma.vmem_to_hbm [thread:$0]  %s763_s27, 32, %s1380_s15, [#allocation4]  }
 0x800   :  { %1068 = dma.done.wait [#allocation4], 32  }
 0x801   :  { %1069 = vsyncadd [#allocation4], 4294967264 }
 0x802   :  { %769 = vsyncpa [#allocation4], 1 }

</bundles_post_ra>
